<compile_context>
chip_gen: v5e
topology: v5e:2x2
jax: 0.10.0
libtpu: 0.0.40
codegen_flags: <defaults>
</compile_context>

<pallas_src>
import functools

import jax
import jax.numpy as jnp
from jax import lax
from jax.experimental import pallas as pl
from jax.experimental.pallas import tpu as pltpu

EPS = 1e-5

_LANES = 128
_RESIDENT_MAX_BYTES = 24 * 1024 * 1024   # in + out + f32 temp budget (fits v7x)
_RESIDENT_VMEM_LIMIT = 48 * 1024 * 1024
_TILED_VMEM_LIMIT = 32 * 1024 * 1024
_TILE_TARGET_BYTES = 2 * 1024 * 1024     # per-input-tile target (f32 worst case)


def _round_up(v, m):
    return ((v + m - 1) // m) * m


def _pack_factor(n, feat):
    """Lane-packing factor k so the working layout is (n/k, k*feat)."""
    if feat >= _LANES or _LANES % feat != 0:
        return 1
    k = _LANES // feat
    return k if n % k == 0 else 1


def _fold_expand(k, feat):
    """Constant 0/1 matrices mapping packed columns <-> features.

    fold:   (k*feat, feat)  per-column stats -> per-feature stats (sum)
    expand: (feat, k*feat)  per-feature scale/shift -> packed columns
    """
    fp = k * feat
    col_feat = jnp.arange(fp, dtype=jnp.int32) % feat
    fold = (col_feat[:, None] == jnp.arange(feat, dtype=jnp.int32)[None, :])
    fold = fold.astype(jnp.float32)
    return fold, fold.T


# --------------------------------------------------------------------------
# Resident fast path: whole (packed) tensor in VMEM, single pass, 2*N*F bytes.
# --------------------------------------------------------------------------
def _resident_kernel(*refs, k, n_total):
    if k > 1:
        x_ref, gamma_ref, beta_ref, fold_ref, expand_ref, o_ref = refs
    else:
        x_ref, gamma_ref, beta_ref, o_ref = refs

    xf = x_ref[...].astype(jnp.float32)                 # (rows, k*feat)
    col_sum = jnp.sum(xf, axis=0, keepdims=True)        # (1, k*feat)
    col_sq = jnp.sum(xf * xf, axis=0, keepdims=True)

    if k > 1:
        # Fold packed lane-groups to per-feature totals via a tiny MXU matmul
        # (avoids cross-lane reshapes).
        s = jnp.dot(col_sum, fold_ref[...], preferred_element_type=jnp.float32)
        sq = jnp.dot(col_sq, fold_ref[...], preferred_element_type=jnp.float32)
    else:
        s, sq = col_sum, col_sq

    inv_n = 1.0 / float(n_total)
    mean = s * inv_n
    var = sq * inv_n - mean * mean                      # biased variance
    inv_std = lax.rsqrt(var + EPS)                      # EUP, ~free
    scale = gamma_ref[...].astype(jnp.float32) * inv_std
    shift = beta_ref[...].astype(jnp.float32) - mean * scale

    if k > 1:
        # Broadcast per-feature scale/shift back to the packed lane layout.
        scale = jnp.dot(scale, expand_ref[...], preferred_element_type=jnp.float32)
        shift = jnp.dot(shift, expand_ref[...], preferred_element_type=jnp.float32)

    o_ref[...] = (xf * scale + shift).astype(o_ref.dtype)


def _resident_call(xp, gamma2, beta2, k, feat, n_total):
    rows, fp = xp.shape
    args = [xp, gamma2, beta2]
    if k > 1:
        fold, expand = _fold_expand(k, feat)
        args += [fold, expand]
    in_specs = [pl.BlockSpec(memory_space=pltpu.MemorySpace.VMEM)] * len(args)
    bytes_acc = 2 * xp.size * xp.dtype.itemsize + 2 * feat * 4
    return pl.pallas_call(
        functools.partial(_resident_kernel, k=k, n_total=n_total),
        out_shape=jax.ShapeDtypeStruct((rows, fp), xp.dtype),
        in_specs=in_specs,
        out_specs=pl.BlockSpec(memory_space=pltpu.MemorySpace.VMEM),
        compiler_params=pltpu.CompilerParams(
            vmem_limit_bytes=_RESIDENT_VMEM_LIMIT),
        cost_estimate=pl.CostEstimate(
            flops=8 * n_total * feat,
            transcendentals=feat,
            bytes_accessed=int(bytes_acc)),
    )(*args)


# --------------------------------------------------------------------------
# Tiled two-pass path: stats accumulation + parallel normalize.
# --------------------------------------------------------------------------
def _stats_kernel(x_ref, sum_ref, sq_ref, *, n_valid):
    i = pl.program_id(0)
    tn = x_ref.shape[0]

    @pl.when(i == 0)
    def _init():
        sum_ref[...] = jnp.zeros_like(sum_ref)
        sq_ref[...] = jnp.zeros_like(sq_ref)

    x = x_ref[...].astype(jnp.float32)
    row = lax.broadcasted_iota(jnp.int32, x.shape, 0) + i * tn
    x = jnp.where(row < n_valid, x, 0.0)          # mask ragged last tile
    sum_ref[...] += jnp.sum(x, axis=0, keepdims=True)
    sq_ref[...] += jnp.sum(x * x, axis=0, keepdims=True)


def _normalize_kernel(x_ref, scale_ref, shift_ref, o_ref):
    x = x_ref[...].astype(jnp.float32)
    o_ref[...] = (x * scale_ref[...] + shift_ref[...]).astype(o_ref.dtype)


def _tiled_call(xp, gamma, beta, k, feat, n_total, tile_rows=None):
    rows, fp = xp.shape
    if tile_rows is None:
        tn = min(1024, max(8, _TILE_TARGET_BYTES // (fp * 4)))
    else:
        tn = tile_rows
    tn = max(8, (tn // 8) * 8)
    tn = min(tn, _round_up(rows, 8))
    grid = (pl.cdiv(rows, tn),)
    itemsize = xp.dtype.itemsize

    # Pass 1: per-column sum / sum-of-squares.
    col_sum, col_sq = pl.pallas_call(
        functools.partial(_stats_kernel, n_valid=rows),
        out_shape=(jax.ShapeDtypeStruct((1, fp), jnp.float32),
                   jax.ShapeDtypeStruct((1, fp), jnp.float32)),
        grid=grid,
        in_specs=[pl.BlockSpec((tn, fp), lambda i: (i, 0))],
        out_specs=(pl.BlockSpec((1, fp), lambda i: (0, 0)),
                   pl.BlockSpec((1, fp), lambda i: (0, 0))),
        compiler_params=pltpu.CompilerParams(
            dimension_semantics=("arbitrary",),
            vmem_limit_bytes=_TILED_VMEM_LIMIT),
        cost_estimate=pl.CostEstimate(
            flops=3 * n_total * feat,
            transcendentals=0,
            bytes_accessed=int(xp.size * itemsize + 8 * fp)),
    )(xp)

    # Finalize stats on tiny (1, fp)/(1, feat) arrays with plain jnp.
    if k > 1:
        s = jnp.sum(col_sum.reshape(k, feat), axis=0, keepdims=True)
        sq = jnp.sum(col_sq.reshape(k, feat), axis=0, keepdims=True)
    else:
        s, sq = col_sum, col_sq
    inv_n = 1.0 / float(n_total)
    mean = s * inv_n
    var = sq * inv_n - mean * mean
    inv_std = lax.rsqrt(var + EPS)
    scale = gamma.astype(jnp.float32)[None, :] * inv_std
    shift = beta.astype(jnp.float32)[None, :] - mean * scale
    if k > 1:
        scale = jnp.tile(scale, (1, k))
        shift = jnp.tile(shift, (1, k))

    # Pass 2: embarrassingly parallel normalize (scale/shift VMEM-resident).
    return pl.pallas_call(
        _normalize_kernel,
        out_shape=jax.ShapeDtypeStruct((rows, fp), xp.dtype),
        grid=grid,
        in_specs=[pl.BlockSpec((tn, fp), lambda i: (i, 0)),
                  pl.BlockSpec((1, fp), lambda i: (0, 0)),
                  pl.BlockSpec((1, fp), lambda i: (0, 0))],
        out_specs=pl.BlockSpec((tn, fp), lambda i: (i, 0)),
        compiler_params=pltpu.CompilerParams(
            dimension_semantics=("parallel",),
            vmem_limit_bytes=_TILED_VMEM_LIMIT),
        cost_estimate=pl.CostEstimate(
            flops=2 * n_total * feat,
            transcendentals=0,
            bytes_accessed=int(2 * xp.size * itemsize + 8 * fp)),
    )(xp, scale, shift)


# --------------------------------------------------------------------------
# Public wrapper (forward of ReshapeBatchNorm, training-mode statistics).
# --------------------------------------------------------------------------
def reshape_batch_norm(x, gamma, beta, *, force_tiled=False, tile_rows=None):
    """x: (batch, num, feat); gamma/beta: (feat,). Returns (batch, num, feat)."""
    assert x.ndim == 3
    b, num, feat = x.shape
    n = b * num
    k = _pack_factor(n, feat)          # lane-dense packing factor
    rows, fp = n // k, k * feat
    xp = x.reshape(rows, fp)           # row-major pack; exact inverse on output

    itemsize = x.dtype.itemsize
    resident_bytes = rows * fp * (2 * itemsize + 4)   # in + out + f32 temp
    if not force_tiled and resident_bytes <= _RESIDENT_MAX_BYTES:
        out = _resident_call(xp, gamma.reshape(1, feat), beta.reshape(1, feat),
                             k, feat, n)
    else:
        out = _tiled_call(xp, gamma, beta, k, feat, n, tile_rows=tile_rows)
    return out.reshape(b, num, feat)


def _reference(x, gamma, beta):
    b, num, feat = x.shape
    xf = x.reshape(b * num, feat).astype(jnp.float32)
    mean = jnp.mean(xf, axis=0, keepdims=True)
    var = jnp.mean((xf - mean) ** 2, axis=0, keepdims=True)
    y = (xf - mean) / jnp.sqrt(var + EPS) * gamma[None, :] + beta[None, :]
    return y.reshape(b, num, feat).astype(x.dtype)


if __name__ == "__main__":
    root = jax.random.PRNGKey(0)

    def run_case(batch, num, feat, **kwargs):
        kx, kg, kb = jax.random.split(
            jax.random.fold_in(root, batch * 1000 + num), 3)
        x = jax.random.normal(kx, (batch, num, feat), dtype=jnp.float32)
        gamma = 1.0 + 0.1 * jax.random.normal(kg, (feat,), dtype=jnp.float32)
        beta = 0.1 * jax.random.normal(kb, (feat,), dtype=jnp.float32)
        y = jax.block_until_ready(reshape_batch_norm(x, gamma, beta, **kwargs))
        y_ref = _reference(x, gamma, beta)
        assert y.shape == (batch, num, feat)
        err = float(jnp.max(jnp.abs(y - y_ref)))
        assert err < 1e-4, (batch, num, feat, err)

    # Packed (feat=32 -> 4x lane packing), resident fast path.
    run_case(2, 8, 32)
    # Unpacked resident path (N not divisible by the pack factor).
    run_case(3, 5, 32)
    # Tiled two-pass path with a ragged last tile (exercises masking + grid).
    run_case(4, 200, 32, force_tiled=True, tile_rows=64)

    print("KERNEL_OK")
</pallas_src>

<mosaic_0001>
module attributes {stable_mosaic.version = 11 : i64} {
  func.func @_resident_kernel(%arg0: memref<4x128xf32, #tpu.memory_space<vmem>>, %arg1: memref<1x32xf32, #tpu.memory_space<vmem>>, %arg2: memref<1x32xf32, #tpu.memory_space<vmem>>, %arg3: memref<128x32xf32, #tpu.memory_space<vmem>>, %arg4: memref<32x128xf32, #tpu.memory_space<vmem>>, %arg5: memref<4x128xf32, #tpu.memory_space<vmem>>) attributes {dimension_semantics = [], scalar_prefetch = 0 : i64, scratch_operands = 0 : i64, tpu.core_type = #tpu.core_type<tc>} {
    %c0 = arith.constant 0 : index
    %c0_0 = arith.constant 0 : index
    %0 = vector.load %arg0[%c0, %c0_0] : memref<4x128xf32, #tpu.memory_space<vmem>>, vector<4x128xf32>
    %cst = arith.constant dense<0.000000e+00> : vector<128xf32>
    %1 = vector.multi_reduction <add>, %0, %cst [0] : vector<4x128xf32> to vector<128xf32>
    %2 = vector.shape_cast %1 : vector<128xf32> to vector<1x128xf32>
    %3 = arith.mulf %0, %0 : vector<4x128xf32>
    %cst_1 = arith.constant dense<0.000000e+00> : vector<128xf32>
    %4 = vector.multi_reduction <add>, %3, %cst_1 [0] : vector<4x128xf32> to vector<128xf32>
    %5 = vector.shape_cast %4 : vector<128xf32> to vector<1x128xf32>
    %c0_2 = arith.constant 0 : index
    %c0_3 = arith.constant 0 : index
    %6 = vector.load %arg3[%c0_2, %c0_3] : memref<128x32xf32, #tpu.memory_space<vmem>>, vector<128x32xf32>
    %cst_4 = arith.constant dense<0.000000e+00> : vector<1x32xf32>
    %7 = tpu.matmul %2, %6, %cst_4 {dimension_numbers = #tpu.dot_dimension_numbers<[1], [0], [0], [1], [0, 0, 1, 1], [], []>} : vector<1x128xf32>, vector<128x32xf32>, vector<1x32xf32> -> vector<1x32xf32>
    %c0_5 = arith.constant 0 : index
    %c0_6 = arith.constant 0 : index
    %8 = vector.load %arg3[%c0_5, %c0_6] : memref<128x32xf32, #tpu.memory_space<vmem>>, vector<128x32xf32>
    %cst_7 = arith.constant dense<0.000000e+00> : vector<1x32xf32>
    %9 = tpu.matmul %5, %8, %cst_7 {dimension_numbers = #tpu.dot_dimension_numbers<[1], [0], [0], [1], [0, 0, 1, 1], [], []>} : vector<1x128xf32>, vector<128x32xf32>, vector<1x32xf32> -> vector<1x32xf32>
    %cst_8 = arith.constant 6.250000e-02 : f32
    %10 = vector.broadcast %cst_8 : f32 to vector<1x32xf32>
    %11 = arith.mulf %7, %10 : vector<1x32xf32>
    %cst_9 = arith.constant 6.250000e-02 : f32
    %12 = vector.broadcast %cst_9 : f32 to vector<1x32xf32>
    %13 = arith.mulf %9, %12 : vector<1x32xf32>
    %14 = arith.mulf %11, %11 : vector<1x32xf32>
    %15 = arith.subf %13, %14 : vector<1x32xf32>
    %cst_10 = arith.constant 9.99999974E-6 : f32
    %16 = vector.broadcast %cst_10 : f32 to vector<1x32xf32>
    %17 = arith.addf %15, %16 : vector<1x32xf32>
    %18 = math.rsqrt %17 : vector<1x32xf32>
    %c0_11 = arith.constant 0 : index
    %c0_12 = arith.constant 0 : index
    %19 = vector.load %arg1[%c0_11, %c0_12] : memref<1x32xf32, #tpu.memory_space<vmem>>, vector<1x32xf32>
    %20 = arith.mulf %19, %18 : vector<1x32xf32>
    %c0_13 = arith.constant 0 : index
    %c0_14 = arith.constant 0 : index
    %21 = vector.load %arg2[%c0_13, %c0_14] : memref<1x32xf32, #tpu.memory_space<vmem>>, vector<1x32xf32>
    %22 = arith.mulf %11, %20 : vector<1x32xf32>
    %23 = arith.subf %21, %22 : vector<1x32xf32>
    %c0_15 = arith.constant 0 : index
    %c0_16 = arith.constant 0 : index
    %24 = vector.load %arg4[%c0_15, %c0_16] : memref<32x128xf32, #tpu.memory_space<vmem>>, vector<32x128xf32>
    %cst_17 = arith.constant dense<0.000000e+00> : vector<1x128xf32>
    %25 = tpu.matmul %20, %24, %cst_17 {dimension_numbers = #tpu.dot_dimension_numbers<[1], [0], [0], [1], [0, 0, 1, 1], [], []>} : vector<1x32xf32>, vector<32x128xf32>, vector<1x128xf32> -> vector<1x128xf32>
    %c0_18 = arith.constant 0 : index
    %c0_19 = arith.constant 0 : index
    %26 = vector.load %arg4[%c0_18, %c0_19] : memref<32x128xf32, #tpu.memory_space<vmem>>, vector<32x128xf32>
    %cst_20 = arith.constant dense<0.000000e+00> : vector<1x128xf32>
    %27 = tpu.matmul %23, %26, %cst_20 {dimension_numbers = #tpu.dot_dimension_numbers<[1], [0], [0], [1], [0, 0, 1, 1], [], []>} : vector<1x32xf32>, vector<32x128xf32>, vector<1x128xf32> -> vector<1x128xf32>
    %28 = vector.broadcast %25 : vector<1x128xf32> to vector<4x128xf32>
    %29 = arith.mulf %0, %28 : vector<4x128xf32>
    %30 = vector.broadcast %27 : vector<1x128xf32> to vector<4x128xf32>
    %31 = arith.addf %29, %30 : vector<4x128xf32>
    %c0_21 = arith.constant 0 : index
    %c0_22 = arith.constant 0 : index
    %32 = vector.load %arg5[%c0_21, %c0_22] : memref<4x128xf32, #tpu.memory_space<vmem>>, vector<4x128xf32>
    tpu.vector_store %arg5[%c0_21, %c0_22], %31 {strides = array<i32>} : memref<4x128xf32, #tpu.memory_space<vmem>>, vector<4x128xf32>,
    return
  }
}

</mosaic_0001>

<bundles_post_ra>
// kernel: tpu_custom_call.1
= control target key start
LH: loop header
LB: loop body
LE: loop exit
PB: predicated region body
PF: predicated region fallthrough
CT: control target
= control target key end

     0   :  { %vm22_vm0 = vcmask 1043456   ;;  %s326_s0 = inlined_call_operand.vmem [shape: f32[4,128], index: 0, kind: input, shape index: {}]   ;;  %s327_s1 = inlined_call_operand.vmem [shape: f32[1,32], index: 1, kind: input, shape index: {}]   ;;  %s328_s2 = inlined_call_operand.vmem [shape: f32[1,32], index: 2, kind: input, shape index: {}]   ;;  %s329_s3 = inlined_call_operand.vmem [shape: f32[128,32], index: 3, kind: input, shape index: {}]   ;;  %s330_s4 = inlined_call_operand.vmem [shape: f32[32,128], index: 4, kind: input, shape index: {}]   ;;  %s331_s5 = inlined_call_operand.hbm [shape: f32[4,128], index: 5, kind: output, shape index: {}]  }
   0x1   :  { %v53_v0 = vld [vmem:[%s329_s3 + $0x78] sm:$0xff]  ;;  %v52_v1 = vld [vmem:[%s329_s3 + $0x70] sm:$0xff]  ;;  %v51_v2 = vld [vmem:[%s329_s3 + $0x68] sm:$0xff] }
   0x2   :  { %54 = vmatpush.msra.mxu0 %v53_v0  ;;  %74 = vmatpush.msra.mxu1 %v53_v0  ;;  %v50_v3 = vld [vmem:[%s329_s3 + $0x60] sm:$0xff] }
   0x3   :  { %v263_v4 = vld [vmem:[%s326_s0] sm:$0xf] }
   0x4   :  { %55 = vmatpush.msra.mxu0 %v52_v1  ;;  %75 = vmatpush.msra.mxu1 %v52_v1 }
   0x6   :  { %56 = vmatpush.msra.mxu0 %v51_v2  ;;  %76 = vmatpush.msra.mxu1 %v51_v2 }
   0x7   :  { %10 = vsyncpa [#allocation3], 0  ;;  %v49_v5 = vld [vmem:[%s329_s3 + $0x58] sm:$0xff]  ;;  %v23_v6 = vsel %vm22_vm0, %v263_v4, 0.0  ;;  %v30_v7 = vmul.f32 %v263_v4, %v263_v4  ;;  %v48_v8 = vld [vmem:[%s329_s3 + $0x50] sm:$0xff]  ;;  %vm118_vm4 = vcmask 261120  }
   0x8   :  { %57 = vmatpush.msra.mxu0 %v50_v3  ;;  %77 = vmatpush.msra.mxu1 %v50_v3  ;;  %v24_v9 = vrot.slane %v23_v6, 4  ;;  %v47_v12 = vld [vmem:[%s329_s3 + $0x48] sm:$0xff]  ;;  %v46_v13 = vld [vmem:[%s329_s3 + $0x40] sm:$0xff]  ;;  %v45_v16 = vld [vmem:[%s329_s3 + $0x38] sm:$0xff]  ;;  %s217_s10 = smov [#allocation2]  }
   0x9   :  { %v31_v10 = vsel %vm22_vm0, %v30_v7, 0.0  ;;  %v44_v17 = vld [vmem:[%s329_s3 + $0x30] sm:$0xff]  ;;  %v43_v20 = vld [vmem:[%s329_s3 + $0x28] sm:$0xff]  ;;  %v42_v21 = vld [vmem:[%s329_s3 + $0x20] sm:$0xff]  ;;  %s175_s11 = sshll.u32 %s217_s10, 4  ;;  %s176_s11 = int_to_ptr.vmem [resolvable:$true] %s175_s11 }
   0xa   :  { %58 = vmatpush.msra.mxu0 %v49_v5  ;;  %78 = vmatpush.msra.mxu1 %v49_v5  ;;  %v32_v11 = vrot.slane %v31_v10, 4  ;;  %v25_v14 = vadd.f32 %v24_v9, %v23_v6  ;;  %v41_v24 = vld [vmem:[%s329_s3 + $0x18] sm:$0xff]  ;;  %v40_v25 = vld [vmem:[%s329_s3 + $0x10] sm:$0xff]  ;;  %v39_v28 = vld [vmem:[%s329_s3 + $0x8] sm:$0xff] }
   0xb   :  { %v38_v29 = vld [vmem:[%s329_s3] sm:$0xff]  ;;  %v117_v32 = vld [vmem:[%s330_s4 + $0x18] sm:$0xff]  ;;  %v116_v33 = vld [vmem:[%s330_s4 + $0x10] sm:$0xff] }
   0xc   :  { %59 = vmatpush.msra.mxu0 %v48_v8  ;;  %79 = vmatpush.msra.mxu1 %v48_v8  ;;  %v33_v15 = vadd.f32 %v32_v11, %v31_v10  ;;  %v26_v18 = vrot.slane %v25_v14, 2  ;;  %v115_v34 = vld [vmem:[%s330_s4 + $0x8] sm:$0xff]  ;;  %v114_v35 = vld [vmem:[%s330_s4] sm:$0xff] }
   0xd   :  { %134 = vmatpush.msra.mxu2 %v117_v32  ;;  %157 = vmatpush.msra.mxu3 %v117_v32  ;;  %v109_v49 = vld [vmem:[%s327_s1] sm:$0x1]  ;;  %s177_s1 = sshll.u32 %s331_s5, 4  ;;  %s178_s1 = int_to_ptr.hbm [resolvable:$true] %s177_s1 }
   0xe   :  { %60 = vmatpush.msra.mxu0 %v47_v12  ;;  %80 = vmatpush.msra.mxu1 %v47_v12  ;;  %v34_v19 = vrot.slane %v33_v15, 2  ;;  %v27_v22 = vadd.f32 %v26_v18, %v25_v14  ;;  %v111_v52 = vld [vmem:[%s328_s2] sm:$0x1] }
   0xf   :  { %135 = vmatpush.msra.mxu2 %v116_v33  ;;  %158 = vmatpush.msra.mxu3 %v116_v33 }
  0x10   :  { %61 = vmatpush.msra.mxu0 %v46_v13  ;;  %81 = vmatpush.msra.mxu1 %v46_v13  ;;  %v35_v23 = vadd.f32 %v34_v19, %v33_v15  ;;  %v28_v26 = vrot.slane %v27_v22, 1 }
  0x11   :  { %136 = vmatpush.msra.mxu2 %v115_v34  ;;  %159 = vmatpush.msra.mxu3 %v115_v34 }
  0x12   :  { %62 = vmatpush.msra.mxu0 %v45_v16  ;;  %82 = vmatpush.msra.mxu1 %v45_v16  ;;  %v36_v27 = vrot.slane %v35_v23, 1  ;;  %v29_v30 = vadd.f32 %v28_v26, %v27_v22 }
  0x13   :  { %137 = vmatpush.msra.mxu2 %v114_v35  ;;  %160 = vmatpush.msra.mxu3 %v114_v35 }
  0x14   :  { %63 = vmatpush.msra.mxu0 %v44_v17  ;;  %83 = vmatpush.msra.mxu1 %v44_v17  ;;  %v37_v31 = vadd.f32 %v36_v27, %v35_v23 }
  0x16   :  { %64 = vmatpush.msra.mxu0 %v43_v20  ;;  %84 = vmatpush.msra.mxu1 %v43_v20 }
  0x18   :  { %65 = vmatpush.msra.mxu0 %v42_v21  ;;  %85 = vmatpush.msra.mxu1 %v42_v21 }
  0x1a   :  { %66 = vmatpush.msra.mxu0 %v41_v24  ;;  %86 = vmatpush.msra.mxu1 %v41_v24 }
  0x1c   :  { %67 = vmatpush.msra.mxu0 %v40_v25  ;;  %87 = vmatpush.msra.mxu1 %v40_v25 }
  0x1e   :  { %68 = vmatpush.msra.mxu0 %v39_v28  ;;  %88 = vmatpush.msra.mxu1 %v39_v28 }
  0x20   :  { %69 = vmatpush.msra.mxu0 %v38_v29  ;;  %89 = vmatpush.msra.mxu1 %v38_v29 }
  0x21   :  { %70 = vmatmul.f32.vlgmr.msra.gmra.mxu0 %v29_v30  ;;  %90 = vmatmul.f32.vlgmr.msra.gmra.mxu1 %v37_v31 }
  0x9e   :  { %v71_v36 = vpop.f32.mrf.mxu0  ;;  %v91_v37 = vpop.f32.mrf.mxu1 }
  0x9f   :  { %v94_v38 = vmul.f32 0.0625, %v71_v36  ;;  %v95_v39 = vmul.f32 0.0625, %v91_v37 }
  0xa1   :  { %v96_v40 = vmul.f32 %v94_v38, %v94_v38 }
  0xa3   :  { %v97_v41 = vsub.f32 %v95_v39, %v96_v40 }
  0xa5   :  { %v98_v42 = vadd.f32 1e-05, %v97_v41 }
  0xa7   :  { %189 = vrsqrt.f32 %v98_v42  ;;  %vm105_vm2 = vweird.f32 %v98_v42 }
  0xad   :  { %v190_v43 = vpop.eup %189 }
  0xae   :  { %v100_v44 = vmul.f32 %v190_v43, %v98_v42  ;;  %vm106_vm1 = vweird.f32 %v190_v43 }
  0xaf   :  { %vm107_vm3 = vmor %vm105_vm2, %vm106_vm1 }
  0xb0   :  { %v101_v45 = vmul.f32 %v190_v43, %v100_v44 }
  0xb2   :  { %v102_v46 = vmul.f32 0.5, %v101_v45 }
  0xb4   :  { %v103_v47 = vsub.f32 1.5, %v102_v46 }
  0xb6   :  { %v104_v48 = vmul.f32 %v190_v43, %v103_v47 }
  0xb8   :  { %v108_v50 = vsel %vm107_vm3, %v190_v43, %v104_v48 }
  0xb9   :  { %v110_v51 = vmul.f32 %v109_v49, %v108_v50 }
  0xbb   :  { %186 = vmatmul.msk.f32.vlgmr.msra.gmra.mxu2 %vm118_vm4, %v110_v51  ;;  %v112_v53 = vmul.f32 %v110_v51, %v94_v38 }
  0xbd   :  { %v113_v54 = vsub.f32 %v111_v52, %v112_v53 }
  0xbf   :  { %187 = vmatmul.msk.f32.vlgmr.msra.gmra.mxu3 %vm118_vm4, %v113_v54 }
 0x13e   :  { %v139_v55 = vpop.f32.mrf.mxu2 }
 0x13f   :  { %v165_v56 = vperm.slane %v139_v55, 0 }
 0x141   :  { %v166_v58 = vmul.f32 %v165_v56, %v263_v4 }
 0x142   :  { %v162_v57 = vpop.f32.mrf.mxu3 }
 0x143   :  { %v167_v59 = vperm.slane %v162_v57, 0 }
 0x145   :  { %v168_v60 = vadd.f32 %v167_v59, %v166_v58 }
 0x147   :  { %169 = vst [vmem:[#allocation2] sm:$0xf] %v168_v60 }
 0x148   :  { %180 = dma.vmem_to_hbm [thread:$0]  %s176_s11, 64, %s178_s1, [#allocation3]  }
 0x149   :  { %215 = dma.done.wait [#allocation3], 64  }
 0x14a   :  { %216 = vsyncadd [#allocation3], 4294967232 }
 0x14b   :  { %185 = vsyncpa [#allocation3], 1 }

</bundles_post_ra>
